<compile_context>
chip_gen: v7x
topology: tpu7x:2x2x1
jax: 0.10.0
libtpu: 0.0.40
codegen_flags: <defaults>
</compile_context>

<pallas_src>
import jax
import jax.numpy as jnp
from jax.experimental import pallas as pl
from jax.experimental.pallas import tpu as pltpu

_PACK = 8  # original rows packed per block-diagonal group (one sublane's worth)


def _mvn_mean_kernel(x_ref, w_ref, b_ref, mean_ref):
    """One tile of packed rows: mean = tanh(x_packed @ W_bd + b_bd).

    x_ref   : (tb8, 8K) float32   -- 8 original rows flattened per packed row
    w_ref   : (8K, 8N)  bfloat16  -- block-diagonal copies of W.T (VMEM-resident)
    b_ref   : (1, 8N)   float32   -- bias tiled 8x (VMEM-resident)
    mean_ref: (tb8, 8N)           -- tanh output, 8 original rows per packed row
    """
    # In-kernel bf16 cast (VPU, hidden under DMA) instead of an extra HBM
    # convert pass over x in the wrapper.
    x = x_ref[...].astype(jnp.bfloat16)
    z = jnp.dot(x, w_ref[...], preferred_element_type=jnp.float32)
    mean_ref[...] = jnp.tanh(z + b_ref[...]).astype(mean_ref.dtype)


def _round_up(v, m):
    return ((v + m - 1) // m) * m


def _choose_tile_and_vmem(b8, rk, rn, out_itemsize):
    """Pick the packed-row tile size and scoped VMEM limit per TPU generation."""
    try:
        info = pltpu.get_tpu_info()
        vmem_phys = int(getattr(info, "vmem_capacity_bytes", 128 * 1024 * 1024))
    except Exception:
        vmem_phys = 128 * 1024 * 1024
    # ~48 MiB on v7x (64 MiB physical), ~96 MiB on v5e/v6e (128 MiB physical).
    vmem_limit = min((vmem_phys * 3) // 4, 100 * 1024 * 1024)

    resident = rk * rn * 2 + rn * 4                  # W_bd (bf16) + bias (f32)
    per_prow = 2 * (rk * 4 + rn * out_itemsize)      # double-buffered x + mean per packed row
    budget = vmem_limit - resident - (4 << 20)       # headroom for internal scratch
    tb8_cap = max(8, budget // per_prow)
    tb8_cap = min(tb8_cap, 8192)                     # 8192 packed rows == 64K original rows

    if b8 <= 8:
        return b8, vmem_limit                        # single tiny full-extent tile
    tb8 = max(8, (tb8_cap // 8) * 8)
    if tb8 >= b8:
        # Guarantee >=2 grid steps so both v7x TensorCores get work.
        tb8 = max(8, _round_up((b8 + 1) // 2, 8))
    return tb8, vmem_limit


def mvn_output_forward(x, weight, bias, logstd, *,
                       std_x_coef=1.0, std_y_coef=0.5, sigmoid_scale=True,
                       mean_dtype=jnp.float32):
    """Pallas forward for MultivariateNormalOutput.

    x:      (B, num_inputs)  float32
    weight: (num_outputs, num_inputs)   -- PyTorch nn.Linear layout
    bias:   (num_outputs,)
    logstd: (num_outputs,)
    Returns (mean (B, num_outputs) mean_dtype, scale (num_outputs,) f32).
    """
    B, K = x.shape
    N = weight.shape[0]
    R = _PACK

    # Pad batch to a multiple of 8 so rows can be packed 8-per-group.
    b_pad = _round_up(B, R)
    if b_pad != B:
        x = jnp.pad(x, ((0, b_pad - B), (0, 0)))
    b8 = b_pad // R
    rk, rn = R * K, R * N

    # Lane-dense packing. The reshape is a free row-major view; x stays f32.
    x_packed = x.astype(jnp.float32).reshape(b8, rk)
    # Block-diagonal weight: 8 copies of W.T -> (8K, 8N); 256x128 for K=32, N=16.
    w_bd = jnp.kron(jnp.eye(R, dtype=jnp.float32),
                    weight.T.astype(jnp.float32)).astype(jnp.bfloat16)
    b_bd = jnp.tile(bias.astype(jnp.float32), R).reshape(1, rn)

    out_itemsize = jnp.dtype(mean_dtype).itemsize
    tb8, vmem_limit = _choose_tile_and_vmem(b8, rk, rn, out_itemsize)
    grid = (pl.cdiv(b8, tb8),)

    cost = pl.CostEstimate(
        flops=2 * b_pad * K * N,
        transcendentals=b_pad * N,
        bytes_accessed=b_pad * K * 4 + b_pad * N * out_itemsize + rk * rn * 2 + rn * 4,
    )

    mean_packed = pl.pallas_call(
        _mvn_mean_kernel,
        out_shape=jax.ShapeDtypeStruct((b8, rn), mean_dtype),
        grid=grid,
        in_specs=[
            pl.BlockSpec((tb8, rk), lambda i: (i, 0)),    # x: tiled over packed batch
            pl.BlockSpec((rk, rn), lambda i: (0, 0)),     # W_bd: VMEM-resident
            pl.BlockSpec((1, rn), lambda i: (0, 0)),      # bias: VMEM-resident
        ],
        out_specs=pl.BlockSpec((tb8, rn), lambda i: (i, 0)),
        compiler_params=pltpu.CompilerParams(
            dimension_semantics=("parallel",),            # shard batch loop across TCs (v7x)
            vmem_limit_bytes=int(vmem_limit),
        ),
        cost_estimate=cost,
    )(x_packed, w_bd, b_bd)

    # Unpack: (b8, 8N) -> (b_pad, N) is a free row-major reshape; slice off padding.
    mean = mean_packed.reshape(b_pad, N)[:B]

    # scale is x-independent and tiny -> plain JAX (no kernel epilogue work).
    logstd_f32 = logstd.astype(jnp.float32)
    if sigmoid_scale:
        scale = jax.nn.sigmoid(logstd_f32 * (1.0 / float(std_x_coef))) * float(std_y_coef)
    else:
        scale = jnp.exp(logstd_f32)

    return mean, scale


if __name__ == "__main__":
    # Module hyper-params (defaults from the PyTorch __init__)
    num_inputs = 32
    num_outputs = 16
    batch = 8
    std_x_coef = 1.0
    std_y_coef = 0.5
    sigmoid_scale = True

    key = jax.random.PRNGKey(0)
    kx, kw, kx2 = jax.random.split(key, 3)

    x = jax.random.normal(kx, (batch, num_inputs), dtype=jnp.float32)
    # Deterministic synthetic parameter init (nn.Linear shapes: W (out,in), b (out,))
    weight = jax.random.normal(kw, (num_outputs, num_inputs), dtype=jnp.float32) * 0.01
    bias = jnp.zeros((num_outputs,), dtype=jnp.float32)
    # sigmoid_scale=True -> logstd initialized to std_x_coef + zeros(num_outputs)
    logstd = jnp.full((num_outputs,), std_x_coef, dtype=jnp.float32)

    mean, scale = mvn_output_forward(
        x, weight, bias, logstd,
        std_x_coef=std_x_coef, std_y_coef=std_y_coef, sigmoid_scale=sigmoid_scale,
    )
    jax.block_until_ready((mean, scale))

    # Reference check in plain JAX (f32). Tolerance loosened for bf16 MXU inputs
    # (accumulation stays f32; tanh output is in [-1, 1]).
    mean_ref = jnp.tanh(x @ weight.T + bias)
    scale_ref = jax.nn.sigmoid(logstd / std_x_coef) * std_y_coef
    assert mean.shape == (batch, num_outputs) and scale.shape == (num_outputs,)
    assert jnp.allclose(mean, mean_ref, atol=2e-2), "mean mismatch"
    assert jnp.allclose(scale, scale_ref, atol=1e-6), "scale mismatch"

    # Secondary check: batch not a multiple of 8 exercises the padding path.
    batch2 = 13
    x2 = jax.random.normal(kx2, (batch2, num_inputs), dtype=jnp.float32)
    mean2, _ = mvn_output_forward(x2, weight, bias, logstd,
                                  std_x_coef=std_x_coef, std_y_coef=std_y_coef,
                                  sigmoid_scale=sigmoid_scale)
    jax.block_until_ready(mean2)
    mean2_ref = jnp.tanh(x2 @ weight.T + bias)
    assert mean2.shape == (batch2, num_outputs)
    assert jnp.allclose(mean2, mean2_ref, atol=2e-2), "padded-batch mean mismatch"

    print("KERNEL_OK")
</pallas_src>

<mosaic_0001>
module attributes {stable_mosaic.version = 11 : i64} {
  func.func @_mvn_mean_kernel(%arg0: i32, %arg1: memref<1x256xf32, #tpu.memory_space<vmem>>, %arg2: memref<256x128xbf16, #tpu.memory_space<vmem>>, %arg3: memref<1x128xf32, #tpu.memory_space<vmem>>, %arg4: memref<1x128xf32, #tpu.memory_space<vmem>>) attributes {dimension_semantics = [#tpu.dimension_semantics<parallel>], iteration_bounds = array<i64: 1>, scalar_prefetch = 0 : i64, scratch_operands = 0 : i64, tpu.core_type = #tpu.core_type<tc>, window_params = [{transform_indices = @transform_0, window_bounds = array<i64: 1, 256>}, {pipeline_mode = #tpu.pipeline_mode<synchronous>, transform_indices = @transform_1, window_bounds = array<i64: 256, 128>}, {pipeline_mode = #tpu.pipeline_mode<synchronous>, transform_indices = @transform_2, window_bounds = array<i64: 1, 128>}, {transform_indices = @transform_3, window_bounds = array<i64: 1, 128>}]} {
    %c0 = arith.constant 0 : index
    %c0_0 = arith.constant 0 : index
    %0 = vector.load %arg1[%c0, %c0_0] : memref<1x256xf32, #tpu.memory_space<vmem>>, vector<1x256xf32>
    %1 = arith.truncf %0 : vector<1x256xf32> to vector<1x256xbf16>
    %c0_1 = arith.constant 0 : index
    %c0_2 = arith.constant 0 : index
    %2 = vector.load %arg2[%c0_1, %c0_2] : memref<256x128xbf16, #tpu.memory_space<vmem>>, vector<256x128xbf16>
    %cst = arith.constant dense<0.000000e+00> : vector<1x128xf32>
    %3 = tpu.matmul %1, %2, %cst {dimension_numbers = #tpu.dot_dimension_numbers<[1], [0], [0], [1], [0, 0, 1, 1], [], []>} : vector<1x256xbf16>, vector<256x128xbf16>, vector<1x128xf32> -> vector<1x128xf32>
    %c0_3 = arith.constant 0 : index
    %c0_4 = arith.constant 0 : index
    %4 = vector.load %arg3[%c0_3, %c0_4] : memref<1x128xf32, #tpu.memory_space<vmem>>, vector<1x128xf32>
    %5 = arith.addf %3, %4 : vector<1x128xf32>
    %6 = math.tanh %5 : vector<1x128xf32>
    %c0_5 = arith.constant 0 : index
    %c0_6 = arith.constant 0 : index
    %7 = vector.load %arg4[%c0_5, %c0_6] : memref<1x128xf32, #tpu.memory_space<vmem>>, vector<1x128xf32>
    tpu.vector_store %arg4[%c0_5, %c0_6], %6 {strides = array<i32>} : memref<1x128xf32, #tpu.memory_space<vmem>>, vector<1x128xf32>,
    return
  }
  func.func @transform_0(%arg0: i32) -> (i32, i32) {
    %c0_i32 = arith.constant 0 : i32
    %c0_i32_0 = arith.constant 0 : i32
    return %arg0, %c0_i32 : i32, i32
  }
  func.func @transform_1(%arg0: i32) -> (i32, i32) {
    %c0_i32 = arith.constant 0 : i32
    %c0_i32_0 = arith.constant 0 : i32
    %c0_i32_1 = arith.constant 0 : i32
    return %c0_i32, %c0_i32_0 : i32, i32
  }
  func.func @transform_2(%arg0: i32) -> (i32, i32) {
    %c0_i32 = arith.constant 0 : i32
    %c0_i32_0 = arith.constant 0 : i32
    %c0_i32_1 = arith.constant 0 : i32
    return %c0_i32, %c0_i32_0 : i32, i32
  }
  func.func @transform_3(%arg0: i32) -> (i32, i32) {
    %c0_i32 = arith.constant 0 : i32
    %c0_i32_0 = arith.constant 0 : i32
    return %arg0, %c0_i32 : i32, i32
  }
}

</mosaic_0001>

<bundles_post_ra>
// kernel: tpu_custom_call.1
= control target key start
LH: loop header
LB: loop body
LE: loop exit
PB: predicated region body
PF: predicated region fallthrough
CT: control target
= control target key end

     0   :  { %8 = vsyncpa [#allocation3], 0  ;;  %s484_s0 = inlined_call_operand.hbm [shape: f32[1,256], index: 0, kind: input, shape index: {}]   ;;  %s485_s1 = inlined_call_operand.hbm [shape: bf16[256,128], index: 1, kind: input, shape index: {}]   ;;  %s486_s2 = inlined_call_operand.hbm [shape: f32[1,128], index: 2, kind: input, shape index: {}]   ;;  %s487_s3 = inlined_call_operand.hbm [shape: f32[1,128], index: 3, kind: output, shape index: {}]  }
   0x1   :  { %9 = vsyncpa [#allocation6], 0 }
   0x2   :  { %10 = vsyncpa [#allocation4], 0  ;;  %s410_s12 = smov [#allocation5]   ;;  %s316_s16 = scalar_lea.hbm %s485_s1, 2048 }
   0x3   :  { %s26_s13 = sshll.u32 %s410_s12, 4  ;;  %p317_p0 = scmp.ne.s32.totalorder %s485_s1, %s316_s16  ;;  %s27_s13 = int_to_ptr.vmem [resolvable:$true] %s26_s13 }
   0x4   :  { %p320_p1 = scmp.lt.u32.totalorder %s316_s16, %s485_s1 }
   0x6   :  { %p322_p2 = pnand %p320_p1, %p317_p0 }
   0x8   :  { %325 = shalt.err (!%p322_p2)
}
   0x9   :  { %s326_s21 = scalar_lea.vmem %s27_s13, 2048  ;;  %p331_p4 = scmp.lt.s32.totalorder %s27_s13, %s27_s13 }
   0xa   :  { %p327_p3 = scmp.ne.s32.totalorder %s27_s13, %s326_s21  ;;  %p332_p5 = scmp.lt.s32.totalorder %s326_s21, %s326_s21 }
   0xc   :  { %p333_p6 = por %p332_p5, %p331_p4 }
   0xe   :  { %p334_p7 = pnand %p333_p6, %p327_p3 }
  0x10   :  { %337 = shalt.err (!%p334_p7)
}
  0x11   :  { %s411_s22 = smov 64   ;;  %s412_s23 = smov 4  }
  0x12   :  { %32 = dma.hbm_to_vmem [thread:$0]  %s485_s1, 2048, %s27_s13, [#allocation6], %s411_s22, %s411_s22, %s412_s23  }
  0x13   :  { %s413_s26 = smov [#allocation2]   ;;  %s414_s28 = smov [#allocation7]  }
  0x14   :  { %s17_s27 = sshll.u32 %s413_s26, 4  ;;  %s39_s29 = sshll.u32 %s414_s28, 4  ;;  %s18_s27 = int_to_ptr.vmem [resolvable:$true] %s17_s27  ;;  %s40_s29 = int_to_ptr.vmem [resolvable:$true] %s39_s29 }
  0x15   :  { %s338_s5 = scalar_lea.hbm %s484_s0, 32 }
  0x16   :  { %p339_p8 = scmp.ne.s32.totalorder %s484_s0, %s338_s5  ;;  %p342_p9 = scmp.lt.u32.totalorder %s338_s5, %s484_s0 }
  0x18   :  { %p344_p10 = pnand %p342_p9, %p339_p8 }
  0x1a   :  { %347 = shalt.err (!%p344_p10)
}
  0x1b   :  { %s348_s1 = scalar_lea.vmem %s18_s27, 32  ;;  %p353_p12 = scmp.lt.s32.totalorder %s18_s27, %s18_s27 }
  0x1c   :  { %p349_p11 = scmp.ne.s32.totalorder %s18_s27, %s348_s1  ;;  %p354_p13 = scmp.lt.s32.totalorder %s348_s1, %s348_s1 }
  0x1e   :  { %p355_p0 = por %p354_p13, %p353_p12 }
  0x20   :  { %p356_p1 = pnand %p355_p0, %p349_p11 }
  0x22   :  { %359 = shalt.err (!%p356_p1)
}
  0x23   :  { %20 = dma.hbm_to_vmem [thread:$0]  %s484_s0, 32, %s18_s27, [#allocation3]  }
  0x24   :  { %s360_s14 = scalar_lea.hbm %s486_s2, 16 }
  0x25   :  { %p361_p2 = scmp.ne.s32.totalorder %s486_s2, %s360_s14  ;;  %p364_p3 = scmp.lt.u32.totalorder %s360_s14, %s486_s2 }
  0x27   :  { %p366_p4 = pnand %p364_p3, %p361_p2 }
  0x29   :  { %369 = shalt.err (!%p366_p4)
}
  0x2a   :  { %s370_s19 = scalar_lea.vmem %s40_s29, 16  ;;  %s374_s20 = scalar_lea.vmem %s40_s29, 32 }
  0x2b   :  { %p371_p5 = scmp.ne.s32.totalorder %s40_s29, %s370_s19  ;;  %p375_p6 = scmp.lt.s32.totalorder %s40_s29, %s40_s29 }
  0x2c   :  { %p376_p7 = scmp.lt.s32.totalorder %s374_s20, %s370_s19 }
  0x2e   :  { %p377_p8 = por %p376_p7, %p375_p6 }
  0x30   :  { %p378_p9 = pnand %p377_p8, %p371_p5 }
  0x32   :  { %381 = shalt.err (!%p378_p9)
}
  0x33   :  { %42 = dma.hbm_to_vmem [thread:$0]  %s486_s2, 16, %s40_s29, [#allocation6]  }
  0x34   :  { %404 = dma.done.wait [#allocation3], 32  }
  0x35   :  { %405 = vsyncadd [#allocation3], 4294967264 }
  0x36   :  { %406 = dma.done.wait [#allocation6], 2064  }
  0x37   :  { %407 = vsyncadd [#allocation6], 4294965232  ;;  %v298_v0 = vld [vmem:[#allocation5 + $0x40] sm:$0xff]   ;;  %v300_v2 = vld [vmem:[#allocation5 + $0x48] sm:$0xff]   ;;  %v55_v5 = vlaneseq  ;;  %s415_s2 = smov [#allocation8]  }
  0x38   :  { %v299_v1 = vld [vmem:[#allocation5] sm:$0xff]   ;;  %270 = vmatprep.subr.bf16.mxu0 %v298_v0  ;;  %v301_v3 = vld [vmem:[#allocation5 + $0x8] sm:$0xff]   ;;  %v302_v4 = vld [vmem:[#allocation5 + $0x50] sm:$0xff]   ;;  %s244_s22 = sshll.u32 %s415_s2, 4  ;;  %s245_s22 = int_to_ptr.vmem [resolvable:$true] %s244_s22 }
  0x39   :  { %271 = vmatpush3.bf16.msra.mxu0 %v299_v1  ;;  %v303_v6 = vld [vmem:[#allocation5 + $0x10] sm:$0xff]   ;;  %v304_v7 = vld [vmem:[#allocation5 + $0x58] sm:$0xff]   ;;  %v56_v8 = vshrl.u32 %v55_v5, 7  ;;  %v306_v10 = vld [vmem:[#allocation5 + $0x60] sm:$0xff]   ;;  %s382_s23 = scalar_lea.vmem %s245_s22, 16  ;;  %s386_s24 = scalar_lea.vmem %s245_s22, 32 }
  0x3a   :  { %272 = vmatprep.subr.bf16.mxu0 %v300_v2  ;;  %v305_v9 = vld [vmem:[#allocation5 + $0x18] sm:$0xff]   ;;  %v307_v12 = vld [vmem:[#allocation5 + $0x20] sm:$0xff]   ;;  %v308_v13 = vld [vmem:[#allocation5 + $0x68] sm:$0xff]   ;;  %p383_p10 = scmp.ne.s32.totalorder %s245_s22, %s382_s23  ;;  %p387_p11 = scmp.lt.s32.totalorder %s245_s22, %s245_s22 }
  0x3b   :  { %v61_v11 = vsub.s32 1, %v56_v8  ;;  %v53_v14 = vld [vmem:[#allocation2] sm:$0x3]  ;;  %v309_v16 = vld [vmem:[#allocation5 + $0x28] sm:$0xff]   ;;  %v310_v18 = vld [vmem:[#allocation5 + $0x70] sm:$0xff]   ;;  %v57_v19 = vsub.s32 0, %v56_v8  ;;  %p388_p12 = scmp.lt.s32.totalorder %s386_s24, %s382_s23 }
  0x3c   :  { %v311_v20 = vld [vmem:[#allocation5 + $0x30] sm:$0xff]   ;;  %v312_v21 = vld [vmem:[#allocation5 + $0x78] sm:$0xff]   ;;  %v99_v26 = vld [vmem:[#allocation7] sm:$0x1] }
  0x3d   :  { %273 = vmatpush3.bf16.msra.mxu0 %v301_v3  ;;  %v62_v15 = vrot.slane %v53_v14, %v61_v11  ;;  %v58_v22 = vrot.slane %v53_v14, %v57_v19  ;;  %v313_v23 = vld [vmem:[#allocation5 + $0x38] sm:$0xff]   ;;  %p389_p13 = por %p388_p12, %p387_p11 }
  0x3e   :  { %274 = vmatprep.subr.bf16.mxu0 %v302_v4 }
  0x3f   :  { %v66_v17 = vpack.c.bf16 %v62_v15, %v62_v15  ;;  %v65_v24 = vpack.c.bf16 %v58_v22, %v58_v22  ;;  %p390_p0 = pnand %p389_p13, %p383_p10 }
  0x41   :  { %275 = vmatpush3.bf16.msra.mxu0 %v303_v6  ;;  %228 = vmatprep.mubr.bf16.mxu0 %v66_v17 }
  0x42   :  { %276 = vmatprep.subr.bf16.mxu0 %v304_v7 }
  0x45   :  { %277 = vmatpush3.bf16.msra.mxu0 %v305_v9 }
  0x46   :  { %278 = vmatprep.subr.bf16.mxu0 %v306_v10 }
  0x49   :  { %279 = vmatpush3.bf16.msra.mxu0 %v307_v12 }
  0x4a   :  { %280 = vmatprep.subr.bf16.mxu0 %v308_v13 }
  0x4d   :  { %281 = vmatpush3.bf16.msra.mxu0 %v309_v16 }
  0x4e   :  { %282 = vmatprep.subr.bf16.mxu0 %v310_v18 }
  0x51   :  { %283 = vmatpush3.bf16.msra.mxu0 %v311_v20 }
  0x52   :  { %284 = vmatprep.subr.bf16.mxu0 %v312_v21 }
  0x55   :  { %285 = vmatpush3.bf16.msra.mxu0 %v313_v23 }
  0x58   :  { %229 = vmatmul.mubr.bf16.vlgmr.msra.gmra.mrb[0].mxu0 %v65_v24 }
 0x12b   :  { %v286_v25 = vpop.f32.mrb[0].mxu0 }
 0x12c   :  { %v287_v27 = vpop.f32.mrb[1].mxu0 }
 0x12d   :  { %v288_v28 = vadd.f32 %v287_v27, %v286_v25  ;;  %v289_v29 = vpop.f32.mrb[2].mxu0 }
 0x12e   :  { %v290_v30 = vpop.f32.mrb[3].mxu0 }
 0x12f   :  { %v231_v31 = vadd.f32 %v288_v28, %v99_v26 }
 0x131   :  { %314 = vtanh.f32 %v231_v31 }
 0x13b   :  { %v315_v32 = vpop.eup %314 }
 0x13c   :  { %237 = vst [vmem:[#allocation8] sm:$0x1] %v315_v32 }
 0x13d   :  { %393 = shalt.err (!%p390_p0)
}
 0x13e   :  { %s394_s27 = scalar_lea.hbm %s487_s3, 16 }
 0x13f   :  { %p395_p1 = scmp.ne.s32.totalorder %s487_s3, %s394_s27  ;;  %p398_p2 = scmp.lt.u32.totalorder %s394_s27, %s487_s3 }
 0x141   :  { %p400_p3 = pnand %p398_p2, %p395_p1 }
 0x143   :  { %403 = shalt.err (!%p400_p3)
}
 0x144   :  { %247 = dma.vmem_to_hbm [thread:$0]  %s245_s22, 16, %s487_s3, [#allocation4]  }
 0x145   :  { %408 = dma.done.wait [#allocation4], 16  }
 0x146   :  { %409 = vsyncadd [#allocation4], 4294967280 }
 0x147   :  { %251 = vsyncpa [#allocation3], 1 }
 0x148   :  { %252 = vsyncpa [#allocation6], 1 }
 0x149   :  { %253 = vsyncpa [#allocation4], 1 }

</bundles_post_ra>
